<compile_context>
chip_gen: v7x
topology: tpu7x:2x2x1
jax: 0.10.0
libtpu: 0.0.40
codegen_flags: <defaults>
</compile_context>

<pallas_src>
import jax
import jax.numpy as jnp
from jax.experimental import pallas as pl
from jax.experimental.pallas import tpu as pltpu


def fused_heads_kernel(x_ref, w_ref, b_ref, mask_ref, o_ref):
    # x_ref:    (block_m, H)       bf16
    # w_ref:    (H, tile_n)        bf16   (pre-transposed, fused, lane-padded)
    # b_ref:    (1, tile_n)        f32    (fused, lane-padded bias)
    # mask_ref: (1, tile_n)        f32    (1.0 on d0/m0 columns -> sigmoid there)
    # o_ref:    (block_m, tile_n)  f32    (lane-dense output slab)
    y = jnp.dot(x_ref[...], w_ref[...], preferred_element_type=jnp.float32)
    y = y + b_ref[...]
    o_ref[...] = jnp.where(mask_ref[...] != 0.0, jax.nn.sigmoid(y), y).astype(o_ref.dtype)


def _round_up(a, b):
    return -(-a // b) * b


def _row_tiling(m):
    """Row tile (multiple of 8) and padded row count; keep >=2 grid steps when small."""
    if m >= 1024:
        block_m = 512
    elif m >= 256:
        block_m = 256
    else:
        # Small problem: split rows into two tiles so both TCs (v7x) have work.
        half = -(-m // 2)
        block_m = max(8, _round_up(half, 8))
    return block_m, _round_up(m, block_m)


def _col_tiling(n_total):
    """Lane-dense padded output width and an N tile that divides it exactly."""
    n_pad = _round_up(n_total, 128)
    tile_n = 128
    for cand in (512, 384, 256, 128):
        if cand <= n_pad and n_pad % cand == 0:
            tile_n = cand
            break
    return tile_n, n_pad


def bert_pt_heads(x, w_ei, b_ei, w_d0, b_d0, w_m0, b_m0,
                  *, compute_dtype=jnp.bfloat16):
    """Runs the three BERT_PT prediction heads. x: [B, S, H] float32."""
    B, S, H = x.shape
    nv, nd, nm = w_ei.shape[0], w_d0.shape[0], w_m0.shape[0]
    n_total = nv + nd + nm
    tile_n, n_pad = _col_tiling(n_total)

    # --- trace-time weight prep (XLA, done once): fuse, transpose, pad, cast ---
    w_fused = jnp.concatenate([w_ei, w_d0, w_m0], axis=0)          # (n_total, H)
    w_t = jnp.zeros((H, n_pad), jnp.float32).at[:, :n_total].set(w_fused.T)
    b_fused = jnp.zeros((1, n_pad), jnp.float32).at[0, :n_total].set(
        jnp.concatenate([b_ei, b_d0, b_m0], axis=0))
    sig_mask = jnp.zeros((1, n_pad), jnp.float32).at[0, nv:n_total].set(1.0)

    # --- flatten batch*seq into rows and pad to the row tile ---
    M = B * S
    block_m, m_pad = _row_tiling(M)
    x_flat = x.reshape(M, H)
    if m_pad != M:
        x_flat = jnp.pad(x_flat, ((0, m_pad - M), (0, 0)))

    x_c = x_flat.astype(compute_dtype)
    w_c = w_t.astype(compute_dtype)
    grid_m = m_pad // block_m
    grid_n = n_pad // tile_n

    out = pl.pallas_call(
        fused_heads_kernel,
        out_shape=jax.ShapeDtypeStruct((m_pad, n_pad), jnp.float32),
        grid=(grid_m, grid_n),
        in_specs=[
            pl.BlockSpec((block_m, H), lambda i, j: (i, 0)),   # x rows for this step
            pl.BlockSpec((H, tile_n), lambda i, j: (0, j)),    # fused weight N-tile
            pl.BlockSpec((1, tile_n), lambda i, j: (0, j)),    # fused bias N-tile
            pl.BlockSpec((1, tile_n), lambda i, j: (0, j)),    # sigmoid column mask
        ],
        out_specs=pl.BlockSpec((block_m, tile_n), lambda i, j: (i, j)),
        compiler_params=pltpu.CompilerParams(
            dimension_semantics=("parallel", "parallel")),
    )(x_c, w_c, b_fused, sig_mask)

    # --- trace-time post-processing (cheap slices, fused by XLA) ---
    y = out[:M].reshape(B, S, n_pad)
    ei = y[:, 3:, :nv]                       # (B, S-3, nv)  -- no ReLU, per reference
    d0 = y[:, 1, nv:nv + nd]                 # (B, nd)
    m0 = y[:, 2, nv + nd:n_total]            # (B, nm)
    return ei, d0, m0


def _reference(x, w_ei, b_ei, w_d0, b_d0, w_m0, b_m0):
    ei = jnp.einsum("bsh,vh->bsv", x[:, 3:], w_ei) + b_ei
    d0 = jax.nn.sigmoid(x[:, 1] @ w_d0.T + b_d0)
    m0 = jax.nn.sigmoid(x[:, 2] @ w_m0.T + b_m0)
    return ei, d0, m0


if __name__ == "__main__":
    # Small shapes consistent with the module: B batches, S tokens, hidden H,
    # nd diagnoses, nm drugs, nv variables.
    B, S, H = 2, 8, 32
    nd, nm, nv = 8, 8, 16

    key = jax.random.PRNGKey(0)
    kx, k1, k2, k3, k4, k5, k6 = jax.random.split(key, 7)

    # Synthetic BERT output (stand-in for self.bert(...)).
    x = jax.random.normal(kx, (B, S, H), dtype=jnp.float32)

    # Deterministic PyTorch-style linear init: U(-1/sqrt(H), 1/sqrt(H)).
    bound = 1.0 / jnp.sqrt(jnp.float32(H))
    w_ei = jax.random.uniform(k1, (nv, H), jnp.float32, -bound, bound)
    b_ei = jax.random.uniform(k2, (nv,), jnp.float32, -bound, bound)
    w_d0 = jax.random.uniform(k3, (nd, H), jnp.float32, -bound, bound)
    b_d0 = jax.random.uniform(k4, (nd,), jnp.float32, -bound, bound)
    w_m0 = jax.random.uniform(k5, (nm, H), jnp.float32, -bound, bound)
    b_m0 = jax.random.uniform(k6, (nm,), jnp.float32, -bound, bound)

    ei, d0, m0 = bert_pt_heads(x, w_ei, b_ei, w_d0, b_d0, w_m0, b_m0)
    jax.block_until_ready((ei, d0, m0))

    ei_r, d0_r, m0_r = _reference(x, w_ei, b_ei, w_d0, b_d0, w_m0, b_m0)
    assert ei.shape == (B, S - 3, nv) and d0.shape == (B, nd) and m0.shape == (B, nm)
    # bf16 MXU inputs (f32 accumulate/epilogue) vs f32 reference -> loose-ish atol.
    assert jnp.allclose(ei, ei_r, atol=5e-2), float(jnp.max(jnp.abs(ei - ei_r)))
    assert jnp.allclose(d0, d0_r, atol=5e-2), float(jnp.max(jnp.abs(d0 - d0_r)))
    assert jnp.allclose(m0, m0_r, atol=5e-2), float(jnp.max(jnp.abs(m0 - m0_r)))

    print("KERNEL_OK")
</pallas_src>

<mosaic_0001>
module attributes {stable_mosaic.version = 11 : i64} {
  func.func @fused_heads_kernel(%arg0: i32, %arg1: i32, %arg2: memref<8x32xbf16, #tpu.memory_space<vmem>>, %arg3: memref<32x128xbf16, #tpu.memory_space<vmem>>, %arg4: memref<1x128xf32, #tpu.memory_space<vmem>>, %arg5: memref<1x128xf32, #tpu.memory_space<vmem>>, %arg6: memref<8x128xf32, #tpu.memory_space<vmem>>) attributes {dimension_semantics = [#tpu.dimension_semantics<parallel>, #tpu.dimension_semantics<parallel>], iteration_bounds = array<i64: 2, 1>, scalar_prefetch = 0 : i64, scratch_operands = 0 : i64, tpu.core_type = #tpu.core_type<tc>, window_params = [{transform_indices = @transform_0, window_bounds = array<i64: 8, 32>}, {transform_indices = @transform_1, window_bounds = array<i64: 32, 128>}, {transform_indices = @transform_2, window_bounds = array<i64: 1, 128>}, {transform_indices = @transform_3, window_bounds = array<i64: 1, 128>}, {transform_indices = @transform_4, window_bounds = array<i64: 8, 128>}]} {
    %c0 = arith.constant 0 : index
    %c0_0 = arith.constant 0 : index
    %0 = vector.load %arg2[%c0, %c0_0] : memref<8x32xbf16, #tpu.memory_space<vmem>>, vector<8x32xbf16>
    %c0_1 = arith.constant 0 : index
    %c0_2 = arith.constant 0 : index
    %1 = vector.load %arg3[%c0_1, %c0_2] : memref<32x128xbf16, #tpu.memory_space<vmem>>, vector<32x128xbf16>
    %cst = arith.constant dense<0.000000e+00> : vector<8x128xf32>
    %2 = tpu.matmul %0, %1, %cst {dimension_numbers = #tpu.dot_dimension_numbers<[1], [0], [0], [1], [0, 0, 1, 1], [], []>} : vector<8x32xbf16>, vector<32x128xbf16>, vector<8x128xf32> -> vector<8x128xf32>
    %c0_3 = arith.constant 0 : index
    %c0_4 = arith.constant 0 : index
    %3 = vector.load %arg4[%c0_3, %c0_4] : memref<1x128xf32, #tpu.memory_space<vmem>>, vector<1x128xf32>
    %4 = vector.broadcast %3 : vector<1x128xf32> to vector<8x128xf32>
    %5 = arith.addf %2, %4 : vector<8x128xf32>
    %c0_5 = arith.constant 0 : index
    %c0_6 = arith.constant 0 : index
    %6 = vector.load %arg5[%c0_5, %c0_6] : memref<1x128xf32, #tpu.memory_space<vmem>>, vector<1x128xf32>
    %cst_7 = arith.constant 0.000000e+00 : f32
    %7 = vector.broadcast %cst_7 : f32 to vector<1x128xf32>
    %8 = arith.cmpf one, %6, %7 : vector<1x128xf32>
    %9 = arith.negf %5 : vector<8x128xf32>
    %10 = math.exp %9 : vector<8x128xf32>
    %cst_8 = arith.constant 1.000000e+00 : f32
    %11 = vector.broadcast %cst_8 : f32 to vector<8x128xf32>
    %12 = arith.addf %11, %10 : vector<8x128xf32>
    %13 = arith.divf %11, %12 : vector<8x128xf32>
    %14 = vector.shape_cast %8 : vector<1x128xi1> to vector<1x128xi1>
    %15 = vector.broadcast %14 : vector<1x128xi1> to vector<8x128xi1>
    %16 = arith.select %15, %13, %5 : vector<8x128xi1>, vector<8x128xf32>
    %c0_9 = arith.constant 0 : index
    %c0_10 = arith.constant 0 : index
    %17 = vector.load %arg6[%c0_9, %c0_10] : memref<8x128xf32, #tpu.memory_space<vmem>>, vector<8x128xf32>
    tpu.vector_store %arg6[%c0_9, %c0_10], %16 {strides = array<i32>} : memref<8x128xf32, #tpu.memory_space<vmem>>, vector<8x128xf32>,
    return
  }
  func.func @transform_0(%arg0: i32, %arg1: i32) -> (i32, i32) {
    %c0_i32 = arith.constant 0 : i32
    %c0_i32_0 = arith.constant 0 : i32
    return %arg0, %c0_i32 : i32, i32
  }
  func.func @transform_1(%arg0: i32, %arg1: i32) -> (i32, i32) {
    %c0_i32 = arith.constant 0 : i32
    %c0_i32_0 = arith.constant 0 : i32
    return %c0_i32, %arg1 : i32, i32
  }
  func.func @transform_2(%arg0: i32, %arg1: i32) -> (i32, i32) {
    %c0_i32 = arith.constant 0 : i32
    %c0_i32_0 = arith.constant 0 : i32
    return %c0_i32, %arg1 : i32, i32
  }
  func.func @transform_3(%arg0: i32, %arg1: i32) -> (i32, i32) {
    %c0_i32 = arith.constant 0 : i32
    %c0_i32_0 = arith.constant 0 : i32
    return %c0_i32, %arg1 : i32, i32
  }
  func.func @transform_4(%arg0: i32, %arg1: i32) -> (i32, i32) {
    %c0_i32 = arith.constant 0 : i32
    return %arg0, %arg1 : i32, i32
  }
}

</mosaic_0001>

<bundles_post_ra>
// kernel: tpu_custom_call.1
= control target key start
LH: loop header
LB: loop body
LE: loop exit
PB: predicated region body
PF: predicated region fallthrough
CT: control target
= control target key end

     0   :  { %9 = vsyncpa [#allocation3], 0  ;;  %s1009_s0 = inlined_call_operand.hbm [shape: bf16[16,32], index: 0, kind: input, shape index: {}]   ;;  %s1010_s1 = inlined_call_operand.hbm [shape: bf16[32,128], index: 1, kind: input, shape index: {}]   ;;  %s1011_s2 = inlined_call_operand.vmem [shape: f32[1,128], index: 2, kind: input, shape index: {}]   ;;  %s1012_s3 = inlined_call_operand.vmem [shape: f32[1,128], index: 3, kind: input, shape index: {}]   ;;  %s1013_s4 = inlined_call_operand.hbm [shape: f32[16,128], index: 4, kind: output, shape index: {}]  }
   0x1   :  { %11 = vsyncpa [#allocation3 + $0x1], 0 }
   0x2   :  { %12 = vsyncpa [#allocation6], 0 }
   0x3   :  { %13 = vsyncpa [#allocation4], 0 }
   0x4   :  { %15 = vsyncpa [#allocation4 + $0x1], 0  ;;  %s788_s15 = smov 0   ;;  %s790_s16 = smov 0  }
   0x5   :  { %s792_s17 = smov 0   ;;  %s794_s18 = smov 0  }
   0x6   :  { %s796_s19 = smov 0   ;;  %s798_s20 = smov 0  }
   0x7 LB: > { %s492_s21 = sadd.s32 4294967295, %s753_s20   ;;  %s493_s22 = sadd.s32 4294967294, %s753_s20   ;;  %s753_s20 = sphi %s798_s20, %s21_s20   ;;  %s749_s19 = sphi %s796_s19, %s1037_s19   ;;  %s745_s18 = sphi %s794_s18, %s1036_s18   ;;  %s741_s17 = sphi %s792_s17, %s1035_s17   ;;  %s737_s16 = sphi %s790_s16, %s1034_s16   ;;  %s733_s15 = sphi %s788_s15, %s1033_s15  }
   0x8   : > { %p53_p0 = scmp.ne.s32.totalorder %s737_s16, %s733_s15  ;;  %p822_p1 = scmp.eq.s32.totalorder %s492_s21, 0 }
   0x9   : > { %p826_p2 = scmp.eq.s32.totalorder %s492_s21, 1  ;;  %p163_p3 = scmp.eq.s32.totalorder %s493_s22, 1 }
   0xa   : > { %s1018_s23 = scalar_select %p822_p1, 1, 0 }
   0xb   : > { %s1019_s24 = scalar_select %p826_p2, 1, 0 }
   0xc   : > { %p832_p4 = por %p822_p1, %p53_p0  ;;  %p494_p5 = scmp.ge.s32.totalorder %s753_s20, 1 }
   0xd   : > { %p837_p6 = por %p163_p3, %p53_p0  ;;  %p170_p7 = scmp.lt.s32.totalorder %s753_s20, 3 }
   0xe   : > { %s1020_s25 = scalar_select %p832_p4, 1, 0 }
   0xf   : > { %s1021_s26 = scalar_select %p837_p6, 1, 0 }
  0x10   : > { %p842_p8 = pnand %p494_p5, %p170_p7  ;;  %s755_s28 = smov [#allocation5]  }
  0x11   : > { %s184_s29 = sshll.u32 %s755_s28, 4  ;;  %s33_s5 = sadd.s32 1, %s749_s19  ;;  %s185_s29 = int_to_ptr.vmem [resolvable:$true] %s184_s29 }
  0x12   : > { %s1022_s27 = scalar_select %p842_p8, 1, 0 }
  0x13   : > { %p533_p9 = pneg %p842_p8  ;;  %s609_s8 = scalar_lea.hbm %s1010_s1, 256 }
  0x14   : > { %p610_p12 = scmp.ne.s32.totalorder %s1010_s1, %s609_s8  ;;  %p616_p5 = scmp.lt.u32.totalorder %s609_s8, %s1010_s1 }
  0x15   : > { %p851_p11 = pnand %p533_p9, %p822_p1 }
  0x17   : > { %p611_p13 = pneg %p851_p11 }
  0x19   : > { %p612_p0 = pnand %p611_p13, %p610_p12 }
  0x1b   : > { %p613_p3 = pneg %p612_p0 }
  0x1d   : > { %p618_p7 = pnand %p616_p5, %p613_p3 }
  0x1f   : > { %621 = shalt.err (!%p618_p7)
}
  0x20   : > { %s622_s13 = scalar_lea.vmem %s185_s29, 256  ;;  %p630_p1 = scmp.lt.s32.totalorder %s185_s29, %s185_s29 }
  0x21   : > { %p623_p9 = scmp.ne.s32.totalorder %s185_s29, %s622_s13  ;;  %p631_p4 = scmp.lt.s32.totalorder %s622_s13, %s622_s13 }
  0x23   : > { %p625_p10 = pnand %p623_p9, %p611_p13  ;;  %p632_p8 = por %p631_p4, %p630_p1 }
  0x25   : > { %p626_p6 = pneg %p625_p10 }
  0x27   : > { %p633_p2 = pnand %p632_p8, %p626_p6 }
  0x29   : > { %636 = shalt.err (!%p633_p2)
}
  0x2a   : > { %s756_s14 = smov 64   ;;  %s757_s21 = smov 4  }
  0x2b   : > { %536 = dma.hbm_to_vmem [thread:$0]  (!%p851_p11), %s1010_s1, 256, %s185_s29, [#allocation6], %s756_s14, %s756_s14, %s757_s21  }
  0x2c   : > { %p35_p1 = scmp.ge.s32.totalorder %s33_s5, 2  ;;  %s40_s6 = sadd.s32 1, %s741_s17 }
  0x2d   : > { %p47_p2 = scmp.ne.s32.totalorder %s741_s17, %s737_s16  ;;  %p48_p4 = scmp.eq.s32.totalorder %s753_s20, 0 }
  0x2e   : > { %s1039_s5 = smov (%p35_p1, %s33_s5), 0  ;;  %p1025_p8 = scmp.ne.s32.totalorder %s1019_s24, 0 }
  0x2f   : > { %p878_p6 = por %p48_p4, %p47_p2  ;;  %s37_s30 = ssub.s32 %s749_s19, %s1039_s5 }
  0x30   : > { %p884_p10 = por %p1025_p8, %p47_p2  ;;  %p546_p12 = scmp.lt.s32.totalorder %s753_s20, 2 }
  0x31   : > { %p38_p11 = scmp.eq.s32.totalorder %s37_s30, 0  ;;  %s210_s29 = sand.u32 1, %s741_s17  }
  0x32   : > { %s499_s9 = sshll.u32 %s210_s29, 2  ;;  %s500_s11 = sshll.u32 %s749_s19, 6 }
  0x33   : > { %s893_s10 = scalar_select %p38_p11, %s741_s17, %s40_s6  }
  0x34   : > { %s899_s14 = scalar_lea.hbm %s1009_s0, %s500_s11  ;;  %s214_s24 = scalar_lea.vmem [#allocation2], %s499_s9 }
  0x35   : > { %s221_s21 = sshll.u32 %s214_s24, 4  ;;  %p905_p13 = pnand %p546_p12, %p878_p6  ;;  %s901_s21 = int_to_ptr.vmem [resolvable:$true] %s221_s21 }
  0x36   : > { %s211_s28 = scalar_lea.sflag [#allocation3], %s210_s29  ;;  %s637_s6 = scalar_lea.hbm %s899_s14, 64 }
  0x37   : > { %p638_p0 = scmp.ne.s32.totalorder %s899_s14, %s637_s6  ;;  %p639_p3 = pneg %p905_p13 }
  0x38   : > { %s642_s11 = scalar_lea.hbm %s1009_s0, 128  ;;  %p643_p9 = scmp.lt.u32.totalorder %s899_s14, %s1009_s0 }
  0x39   : > { %p640_p5 = pnand %p639_p3, %p638_p0  ;;  %p644_p1 = scmp.lt.u32.totalorder %s642_s11, %s637_s6 }
  0x3a   : > { %p646_p4 = scmp.lt.u32.totalorder %s637_s6, %s899_s14 }
  0x3b   : > { %p641_p7 = pneg %p640_p5  ;;  %p645_p2 = por %p644_p1, %p643_p9 }
  0x3d   : > { %p647_p6 = por %p646_p4, %p645_p2 }
  0x3f   : > { %p648_p8 = pnand %p647_p6, %p641_p7 }
  0x41   : > { %651 = shalt.err (!%p648_p8)
}
  0x42   : > { %s652_s29 = scalar_lea.vmem %s901_s21, 64  ;;  %s758_s13 = smov [#allocation2]  }
  0x43   : > { %p653_p12 = scmp.ne.s32.totalorder %s901_s21, %s652_s29  ;;  %s657_s24 = sshll.u32 %s758_s13, 4  ;;  %s658_s24 = int_to_ptr.vmem [resolvable:$false] %s657_s24 }
  0x44   : > { %s659_s30 = scalar_lea.vmem %s658_s24, 128  ;;  %p660_p5 = scmp.lt.s32.totalorder %s901_s21, %s658_s24 }
  0x45   : > { %p655_p11 = pnand %p653_p12, %p639_p3  ;;  %p661_p9 = scmp.lt.s32.totalorder %s659_s30, %s652_s29 }
  0x47   : > { %p656_p0 = pneg %p655_p11  ;;  %p662_p1 = por %p661_p9, %p660_p5 }
  0x49   : > { %p663_p2 = pnand %p662_p1, %p656_p0 }
  0x4b   : > { %666 = shalt.err (!%p663_p2)
}
  0x4c   : > { %540 = dma.hbm_to_vmem [thread:$0]  (!%p905_p13), %s899_s14, 64, %s901_s21, %s211_s28  }
  0x4d   : > { %p1028_p7 = scmp.ne.s32.totalorder %s1022_s27, 0 }
  0x4e   : > { %s937_s6 = sand.u32 (!%p1028_p7), 1, %s737_s16   ;;  %p1029_p3 = scmp.ne.s32.totalorder (!%p1028_p7), %s1020_s25, 0 }
  0x4f   : > { %230 = sbr.rel (%p1028_p7) target bundleno = 354 (0x162), region = 36  ;;  %s502_s9 = sshll.u32 (!%p1028_p7), %s937_s6, 2 }
  0x50   : > { %s233_s11 = scalar_lea.sflag (!%p1028_p7), [#allocation3], %s937_s6  ;;  %s236_s7 = scalar_lea.vmem (!%p1028_p7), [#allocation2], %s502_s9 }
  0x56   : > { %720 = dma.done.wait (%p1029_p3), %s233_s11, 64  }
  0x57   : > { %722 = vsyncadd (%p1029_p3), %s233_s11, 4294967232  ;;  %p1030_p4 = scmp.ne.s32.totalorder %s1018_s23, 0 }
  0x59   : > { %724 = dma.done.wait (%p1030_p4), [#allocation6], 256  }
  0x5a   : > { %726 = vsyncadd (%p1030_p4), [#allocation6], 4294967040  ;;  %v759_v0 = vmov 0.0   ;;  %vm760_vm0 = vmmov 0   ;;  %v603_v1 = vld [vmem:[#allocation5] sm:$0xff]   ;;  %v604_v2 = vld [vmem:[#allocation5 + $0x8] sm:$0xff]   ;;  %v355_v11 = vlaneseq }
  0x5b   : > { %517 = vmatprep.subr.bf16.mxu0 %v759_v0  ;;  %521 = vmatprep.mubr.msk.bf16.mxu0 %vm760_vm0, %v759_v0  ;;  %v278_v3 = vld [vmem:[%s236_s7] sm:$0xf]  ;;  %vm302_vm1 = vcmask 261120   ;;  %v761_v17 = vmov 0   ;;  %s504_s21 = sshll.u32 %s937_s6, 3  ;;  %s511_s22 = sshll.u32 %s745_s18, 7 }
  0x5c   : > { %518 = vmatpush3.bf16.msra.mxu0 %v603_v1  ;;  %v505_v4 = vld [vmem:[%s1011_s2] ss:$0 sm:$0xff]  ;;  %v356_v13 = vshrl.u32 %v355_v11, 7  ;;  %s270_s28 = scalar_lea.vmem [#allocation7], %s504_s21  ;;  %s960_s24 = scalar_lea.hbm %s1013_s4, %s511_s22 }
  0x5d   : > { %519 = vmatprep.subr.bf16.mxu0 %v759_v0  ;;  %v346_v12 = vld [vmem:[%s1012_s3] sm:$0x1]  ;;  %s377_s12 = sshll.u32 %s270_s28, 4  ;;  %s363_s30 = scalar_lea.sflag [#allocation4], %s937_s6  ;;  %s962_s12 = int_to_ptr.vmem [resolvable:$true] %s377_s12 }
  0x5e   : > { %vm347_vm2 = vcmp.ne.f32.partialorder %v346_v12, 0.0  ;;  %v357_v16 = vsub.s32 0, %v356_v13  ;;  %s667_s9 = scalar_lea.vmem %s962_s12, 128  ;;  %s762_s18 = smov [#allocation7]  }
  0x5f   : > { %v354_v18 = vsel %vm347_vm2, 1, %v761_v17  ;;  %p668_p13 = scmp.ne.s32.totalorder %s962_s12, %s667_s9  ;;  %s671_s11 = sshll.u32 %s762_s18, 4  ;;  %s672_s11 = int_to_ptr.vmem [resolvable:$false] %s671_s11 }
  0x60   : > { %520 = vmatpush3.bf16.msra.mxu0 %v604_v2  ;;  %v358_v19 = vrot.slane %v354_v18, %v357_v16  ;;  %s673_s7 = scalar_lea.vmem %s672_s11, 256  ;;  %p674_p12 = scmp.lt.s32.totalorder %s962_s12, %s672_s11 }
  0x61   : > { %p669_p6 = pnand %p668_p13, %p884_p10  ;;  %p675_p11 = scmp.lt.s32.totalorder %s673_s7, %s667_s9 }
  0x62   : > { %vm359_vm3 = vcmp.eq.s32.totalorder %v358_v19, 1 }
  0x63   : > { %522 = vmatmul.mubr.msk.bf16.vlgmr.msra.gmra.mrb[0].mxu0 %vm302_vm1, %v278_v3  ;;  %p670_p8 = pneg %p669_p6  ;;  %p676_p0 = por %p675_p11, %p674_p12 }
  0x65   : > { %p677_p5 = pnand %p676_p0, %p670_p8 }
 0x136   : > { %v340_v5 = vpop.f32.mrb[0].mxu0 }
 0x137   : > { %v341_v6 = vadd.f32 %v505_v4, %v340_v5  ;;  %v523_v7 = vpop.f32.mrb[1].mxu0 }
 0x138   : > { %v343_v8 = vpop.f32.mrb[2].mxu0 }
 0x139   : > { %v509_v9 = vmul.f32 -1.442695, %v341_v6  ;;  %v524_v10 = vpop.f32.mrb[3].mxu0 }
 0x13b   : > { %605 = vpow2.f32 %v509_v9 }
 0x145   : > { %v606_v14 = vpop.eup %605 }
 0x146   : > { %v351_v15 = vadd.f32 1.0, %v606_v14 }
 0x148   : > { %607 = vrcp.f32 %v351_v15 }
 0x152   : > { %v608_v20 = vpop.eup %607 }
 0x153   : > { %v360_v21 = vsel %vm359_vm3, %v608_v20, %v341_v6 }
 0x154   : > { %361 = vst [vmem:[%s270_s28] sm:$0xff] %v360_v21 }
 0x155   : > { %680 = shalt.err (!%p677_p5)
}
 0x156   : > { %s681_s6 = scalar_lea.hbm %s960_s24, 128  ;;  %s685_s23 = scalar_lea.hbm %s1013_s4, 256 }
 0x157   : > { %p682_p9 = scmp.ne.s32.totalorder %s960_s24, %s681_s6  ;;  %p686_p7 = scmp.lt.u32.totalorder %s960_s24, %s1013_s4 }
 0x158   : > { %p687_p3 = scmp.lt.u32.totalorder %s685_s23, %s681_s6  ;;  %p689_p13 = scmp.lt.u32.totalorder %s681_s6, %s960_s24 }
 0x159   : > { %p683_p1 = pnand %p682_p9, %p884_p10 }
 0x15a   : > { %p688_p4 = por %p687_p3, %p686_p7 }
 0x15b   : > { %p684_p2 = pneg %p683_p1 }
 0x15c   : > { %p690_p6 = por %p689_p13, %p688_p4 }
 0x15e   : > { %p691_p8 = pnand %p690_p6, %p684_p2 }
 0x160   : > { %694 = shalt.err (!%p691_p8)
}
 0x161   : > { %531 = dma.vmem_to_hbm [thread:$0]  (%p884_p10), %s962_s12, 128, %s960_s24, %s363_s30  }
 0x162 PF: > { %s389_s22 = sand.u32 1, %s733_s15   ;;  %p1031_p12 = scmp.ne.s32.totalorder %s1021_s26, 0 }
 0x163   : > { %p1032_p11 = scmp.ge.s32.totalorder %s753_s20, 2  ;;  %s390_s28 = scalar_lea.sflag [#allocation4], %s389_s22 }
 0x165   : > { %p542_p0 = pnand %p1032_p11, %p1031_p12 }
 0x167   : > { %728 = dma.done.wait (!%p542_p0), %s390_s28, 128  }
 0x168   : > { %730 = vsyncadd (!%p542_p0), %s390_s28, 4294967168  ;;  %s21_s20 = sadd.s32 1, %s753_s20   ;;  %s1033_s15 = smov %s737_s16 }
 0x169   : > { %p18_p5 = scmp.ge.s32.totalorder %s21_s20, 4   ;;  %s1034_s16 = smov %s741_s17 }
 0x16a   : > { %s1035_s17 = smov %s893_s10  ;;  %s1036_s18 = smov %s749_s19 }
 0x16b   : > { %s1037_s19 = smov %s1039_s5  ;;  %20 = sbr.rel (!%p18_p5) target bundleno = 7 (0x7), region = 92 }
 0x172   :  { %395 = vsyncpa [#allocation3], 1 }
 0x173   :  { %397 = vsyncpa [#allocation3 + $0x1], 1 }
 0x174   :  { %398 = vsyncpa [#allocation6], 1 }
 0x175   :  { %399 = vsyncpa [#allocation4], 1 }
 0x176   :  { %401 = vsyncpa [#allocation4 + $0x1], 1 }

</bundles_post_ra>
